<compile_context>
chip_gen: v7x
topology: tpu7x:2x2x1
jax: 0.10.0
libtpu: 0.0.40
codegen_flags: <defaults>
</compile_context>

<pallas_src>
import math
import jax
import jax.numpy as jnp
from jax import lax
from jax.experimental import pallas as pl
from jax.experimental.pallas import tpu as pltpu


# --------------------------------------------------------------------------- #
# helpers
# --------------------------------------------------------------------------- #
def _pick_chunk(n, cap, multiple=1):
    """Largest divisor of n that is <= cap and a multiple of `multiple`.

    Falls back to n (single block) if no such divisor exists.
    """
    if n <= cap:
        return n
    best = 0
    for d in range(multiple, cap + 1, multiple):
        if n % d == 0:
            best = d
    return best if best > 0 else n


def _ifgo_to_ifog(a, hidden):
    """Reorder the leading 4H axis from PyTorch [i,f,g,o] to [i,f,o,g]."""
    return jnp.concatenate(
        [a[: 2 * hidden], a[3 * hidden: 4 * hidden], a[2 * hidden: 3 * hidden]], axis=0
    )


# --------------------------------------------------------------------------- #
# Kernel 1: hoisted input projection  pre_gates = x @ W_ih^T + (b_ih + b_hh)
# one big (T*B, D) x (D, 4H) GEMM, tiled over rows
# --------------------------------------------------------------------------- #
def input_proj_kernel(x_ref, w_ref, b_ref, o_ref):
    # x_ref: (TM, D), w_ref: (D, 4H), b_ref: (1, 4H), o_ref: (TM, 4H)
    acc = jnp.dot(x_ref[...], w_ref[...], preferred_element_type=jnp.float32)
    o_ref[...] = (acc + b_ref[...]).astype(o_ref.dtype)


def input_projection(x_flat, w_ih_t, bias):
    M, D = x_flat.shape
    G = w_ih_t.shape[1]  # 4H
    TM = _pick_chunk(M, 256, multiple=8)
    return pl.pallas_call(
        input_proj_kernel,
        out_shape=jax.ShapeDtypeStruct((M, G), jnp.float32),
        grid_spec=pltpu.PrefetchScalarGridSpec(
            num_scalar_prefetch=0,
            grid=(M // TM,),
            in_specs=[
                pl.BlockSpec((TM, D), lambda m: (m, 0)),
                pl.BlockSpec((D, G), lambda m: (0, 0)),
                pl.BlockSpec((1, G), lambda m: (0, 0)),
            ],
            out_specs=pl.BlockSpec((TM, G), lambda m: (m, 0)),
        ),
        compiler_params=pltpu.CompilerParams(dimension_semantics=("parallel",)),
    )(x_flat, w_ih_t, bias)


# --------------------------------------------------------------------------- #
# Kernel 2: time-chunked LSTM recurrence (hidden-sequence output)
# --------------------------------------------------------------------------- #
def lstm_recurrent_kernel(pg_ref, whh_ref, out_ref, h_ref, c_ref):
    # pg_ref:  (Tc, B, 4H)  pre-gates (x@W_ih + bias), gate order [i,f,o,g]
    # whh_ref: (H, 4H)
    # out_ref: (Tc, B, H)
    # h_ref/c_ref: (B, H) VMEM scratch persisting across the time-chunk grid
    @pl.when(pl.program_id(0) == 0)
    def _():
        h_ref[...] = jnp.zeros_like(h_ref)
        c_ref[...] = jnp.zeros_like(c_ref)

    H = h_ref.shape[-1]
    Tc = pg_ref.shape[0]
    whh = whh_ref[...]

    def step(t, carry):
        h, c = carry
        gates = pg_ref[t] + jnp.dot(h, whh, preferred_element_type=jnp.float32)
        sig = jax.nn.sigmoid(gates[:, : 3 * H])     # [i | f | o] in one EUP pass
        g_g = jnp.tanh(gates[:, 3 * H:])            # g
        i_g = sig[:, :H]
        f_g = sig[:, H: 2 * H]
        o_g = sig[:, 2 * H: 3 * H]
        c_new = f_g * c + i_g * g_g
        h_new = o_g * jnp.tanh(c_new)
        out_ref[t] = h_new.astype(out_ref.dtype)
        return h_new, c_new

    h_fin, c_fin = lax.fori_loop(0, Tc, step, (h_ref[...], c_ref[...]), unroll=True)
    h_ref[...] = h_fin
    c_ref[...] = c_fin


def lstm_recurrence(pre_gates, w_hh_t):
    T, B, G = pre_gates.shape
    H = w_hh_t.shape[0]
    Tc = _pick_chunk(T, 16)
    return pl.pallas_call(
        lstm_recurrent_kernel,
        out_shape=jax.ShapeDtypeStruct((T, B, H), jnp.float32),
        grid_spec=pltpu.PrefetchScalarGridSpec(
            num_scalar_prefetch=0,
            grid=(T // Tc,),
            in_specs=[
                pl.BlockSpec((Tc, B, G), lambda t: (t, 0, 0)),
                pl.BlockSpec((H, G), lambda t: (0, 0)),
            ],
            out_specs=pl.BlockSpec((Tc, B, H), lambda t: (t, 0, 0)),
            scratch_shapes=[
                pltpu.VMEM((B, H), jnp.float32),
                pltpu.VMEM((B, H), jnp.float32),
            ],
        ),
        compiler_params=pltpu.CompilerParams(
            dimension_semantics=("arbitrary",)  # sequential recurrence over time
        ),
    )(pre_gates, w_hh_t)


# --------------------------------------------------------------------------- #
# Kernel 3: last-layer recurrence with fused FC(H->1) + Sigmoid head
# --------------------------------------------------------------------------- #
def lstm_last_kernel(pg_ref, whh_ref, wfc_ref, bfc_ref, y_ref, h_ref, c_ref):
    # wfc_ref: (1, H), bfc_ref: (1, 1), y_ref: (Tc, B, 1)
    @pl.when(pl.program_id(0) == 0)
    def _():
        h_ref[...] = jnp.zeros_like(h_ref)
        c_ref[...] = jnp.zeros_like(c_ref)

    H = h_ref.shape[-1]
    Tc = pg_ref.shape[0]
    whh = whh_ref[...]
    wfc = wfc_ref[...]          # (1, H), broadcast over batch
    bfc = bfc_ref[...]          # (1, 1)

    def step(t, carry):
        h, c = carry
        gates = pg_ref[t] + jnp.dot(h, whh, preferred_element_type=jnp.float32)
        sig = jax.nn.sigmoid(gates[:, : 3 * H])
        g_g = jnp.tanh(gates[:, 3 * H:])
        i_g = sig[:, :H]
        f_g = sig[:, H: 2 * H]
        o_g = sig[:, 2 * H: 3 * H]
        c_new = f_g * c + i_g * g_g
        h_new = o_g * jnp.tanh(c_new)
        # fused head: VPU multiply + lane reduction (avoid an N=1 MXU matmul)
        logit = jnp.sum(h_new * wfc, axis=-1, keepdims=True) + bfc   # (B, 1)
        y_ref[t] = jax.nn.sigmoid(logit).astype(y_ref.dtype)
        return h_new, c_new

    h_fin, c_fin = lax.fori_loop(0, Tc, step, (h_ref[...], c_ref[...]), unroll=True)
    h_ref[...] = h_fin
    c_ref[...] = c_fin


def lstm_recurrence_fused_head(pre_gates, w_hh_t, w_fc_row, b_fc):
    T, B, G = pre_gates.shape
    H = w_hh_t.shape[0]
    Tc = _pick_chunk(T, 16)
    return pl.pallas_call(
        lstm_last_kernel,
        out_shape=jax.ShapeDtypeStruct((T, B, 1), jnp.float32),
        grid_spec=pltpu.PrefetchScalarGridSpec(
            num_scalar_prefetch=0,
            grid=(T // Tc,),
            in_specs=[
                pl.BlockSpec((Tc, B, G), lambda t: (t, 0, 0)),
                pl.BlockSpec((H, G), lambda t: (0, 0)),
                pl.BlockSpec((1, H), lambda t: (0, 0)),
                pl.BlockSpec((1, 1), lambda t: (0, 0)),
            ],
            out_specs=pl.BlockSpec((Tc, B, 1), lambda t: (t, 0, 0)),
            scratch_shapes=[
                pltpu.VMEM((B, H), jnp.float32),
                pltpu.VMEM((B, H), jnp.float32),
            ],
        ),
        compiler_params=pltpu.CompilerParams(
            dimension_semantics=("arbitrary",)
        ),
    )(pre_gates, w_hh_t, w_fc_row, b_fc)


# --------------------------------------------------------------------------- #
# full forward (matches PyTorch LSTMClassifier.forward, batch_first)
# --------------------------------------------------------------------------- #
def lstm_classifier_forward(x, kparams):
    """x: (B, T, input_size) float32  ->  (B, T, 1) float32."""
    B, T, _ = x.shape
    seq = jnp.transpose(x, (1, 0, 2))                       # time-major (T, B, D)
    n_layers = len(kparams["lstm"])
    y = None
    for layer, (w_ih_t, w_hh_t, bias) in enumerate(kparams["lstm"]):
        D_in = w_ih_t.shape[0]
        H = w_hh_t.shape[0]
        # hoisted input projection: one big GEMM over all T*B rows, bias folded in
        pre = input_projection(seq.reshape(T * B, D_in), w_ih_t, bias)
        pre = pre.reshape(T, B, 4 * H)
        if layer == n_layers - 1:
            y = lstm_recurrence_fused_head(pre, w_hh_t, kparams["w_fc"], kparams["b_fc"])
        else:
            seq = lstm_recurrence(pre, w_hh_t)              # (T, B, H)
    return jnp.transpose(y, (1, 0, 2))                      # (B, T, 1)


# --------------------------------------------------------------------------- #
# parameters: raw PyTorch-convention init + kernel-ready repack
# --------------------------------------------------------------------------- #
def init_raw_params(key, input_size, hidden_size, num_layers):
    """PyTorch-convention parameters (U(-1/sqrt(H), 1/sqrt(H)))."""
    k = 1.0 / math.sqrt(hidden_size)
    raw = {"lstm": []}
    for layer in range(num_layers):
        d_in = input_size if layer == 0 else hidden_size
        key, k1, k2, k3, k4 = jax.random.split(key, 5)
        w_ih = jax.random.uniform(k1, (4 * hidden_size, d_in), jnp.float32, -k, k)
        w_hh = jax.random.uniform(k2, (4 * hidden_size, hidden_size), jnp.float32, -k, k)
        b_ih = jax.random.uniform(k3, (4 * hidden_size,), jnp.float32, -k, k)
        b_hh = jax.random.uniform(k4, (4 * hidden_size,), jnp.float32, -k, k)
        raw["lstm"].append((w_ih, w_hh, b_ih, b_hh))
    key, k5, k6 = jax.random.split(key, 3)
    raw["w_fc"] = jax.random.uniform(k5, (1, hidden_size), jnp.float32, -k, k)
    raw["b_fc"] = jax.random.uniform(k6, (1,), jnp.float32, -k, k)
    return raw


def prepare_kernel_params(raw, hidden_size):
    """Repack: gate order [i,f,g,o] -> [i,f,o,g], transpose, fold biases."""
    kp = {"lstm": []}
    for (w_ih, w_hh, b_ih, b_hh) in raw["lstm"]:
        w_ih_t = _ifgo_to_ifog(w_ih, hidden_size).T                         # (D_in, 4H)
        w_hh_t = _ifgo_to_ifog(w_hh, hidden_size).T                         # (H, 4H)
        bias = _ifgo_to_ifog(b_ih + b_hh, hidden_size).reshape(1, 4 * hidden_size)
        kp["lstm"].append((w_ih_t, w_hh_t, bias))
    kp["w_fc"] = raw["w_fc"].reshape(1, hidden_size)                        # (1, H)
    kp["b_fc"] = raw["b_fc"].reshape(1, 1)                                  # (1, 1)
    return kp


# --------------------------------------------------------------------------- #
# pure-JAX reference (PyTorch semantics, PyTorch gate order)
# --------------------------------------------------------------------------- #
def reference_forward(x, raw):
    B, T, _ = x.shape
    seq = jnp.transpose(x, (1, 0, 2))
    for (w_ih, w_hh, b_ih, b_hh) in raw["lstm"]:
        H = w_hh.shape[1]
        h = jnp.zeros((B, H), jnp.float32)
        c = jnp.zeros((B, H), jnp.float32)
        outs = []
        for t in range(T):
            gates = seq[t] @ w_ih.T + h @ w_hh.T + b_ih + b_hh
            i = jax.nn.sigmoid(gates[:, 0 * H:1 * H])
            f = jax.nn.sigmoid(gates[:, 1 * H:2 * H])
            g = jnp.tanh(gates[:, 2 * H:3 * H])
            o = jax.nn.sigmoid(gates[:, 3 * H:4 * H])
            c = f * c + i * g
            h = o * jnp.tanh(c)
            outs.append(h)
        seq = jnp.stack(outs, axis=0)
    y = jax.nn.sigmoid(seq @ raw["w_fc"].T + raw["b_fc"])   # (T, B, 1)
    return jnp.transpose(y, (1, 0, 2))


# --------------------------------------------------------------------------- #
if __name__ == "__main__":
    INPUT_SIZE, HIDDEN_SIZE, NUM_LAYERS = 16, 32, 2
    B, T = 2, 8

    key = jax.random.PRNGKey(0)
    key, xkey = jax.random.split(key)
    x = jax.random.normal(xkey, (B, T, INPUT_SIZE), jnp.float32)

    raw_params = init_raw_params(key, INPUT_SIZE, HIDDEN_SIZE, NUM_LAYERS)
    kparams = prepare_kernel_params(raw_params, HIDDEN_SIZE)

    out = jax.block_until_ready(lstm_classifier_forward(x, kparams))
    ref = jax.block_until_ready(reference_forward(x, raw_params))

    assert out.shape == (B, T, 1), out.shape
    assert jnp.allclose(out, ref, rtol=1e-3, atol=1e-3), "mismatch vs reference"

    print("KERNEL_OK")
</pallas_src>

<mosaic_0001>
module attributes {stable_mosaic.version = 11 : i64} {
  func.func @input_proj_kernel(%arg0: i32, %arg1: memref<16x16xf32, #tpu.memory_space<vmem>>, %arg2: memref<16x128xf32, #tpu.memory_space<vmem>>, %arg3: memref<1x128xf32, #tpu.memory_space<vmem>>, %arg4: memref<16x128xf32, #tpu.memory_space<vmem>>) attributes {dimension_semantics = [#tpu.dimension_semantics<parallel>], iteration_bounds = array<i64: 1>, scalar_prefetch = 0 : i64, scratch_operands = 0 : i64, tpu.core_type = #tpu.core_type<tc>, window_params = [{transform_indices = @transform_0, window_bounds = array<i64: 16, 16>}, {pipeline_mode = #tpu.pipeline_mode<synchronous>, transform_indices = @transform_1, window_bounds = array<i64: 16, 128>}, {pipeline_mode = #tpu.pipeline_mode<synchronous>, transform_indices = @transform_2, window_bounds = array<i64: 1, 128>}, {transform_indices = @transform_3, window_bounds = array<i64: 16, 128>}]} {
    %c0 = arith.constant 0 : index
    %c0_0 = arith.constant 0 : index
    %0 = vector.load %arg1[%c0, %c0_0] : memref<16x16xf32, #tpu.memory_space<vmem>>, vector<16x16xf32>
    %c0_1 = arith.constant 0 : index
    %c0_2 = arith.constant 0 : index
    %1 = vector.load %arg2[%c0_1, %c0_2] : memref<16x128xf32, #tpu.memory_space<vmem>>, vector<16x128xf32>
    %cst = arith.constant dense<0.000000e+00> : vector<16x128xf32>
    %2 = tpu.matmul %0, %1, %cst {dimension_numbers = #tpu.dot_dimension_numbers<[1], [0], [0], [1], [0, 0, 1, 1], [], []>} : vector<16x16xf32>, vector<16x128xf32>, vector<16x128xf32> -> vector<16x128xf32>
    %c0_3 = arith.constant 0 : index
    %c0_4 = arith.constant 0 : index
    %3 = vector.load %arg3[%c0_3, %c0_4] : memref<1x128xf32, #tpu.memory_space<vmem>>, vector<1x128xf32>
    %4 = vector.broadcast %3 : vector<1x128xf32> to vector<16x128xf32>
    %5 = arith.addf %2, %4 : vector<16x128xf32>
    %c0_5 = arith.constant 0 : index
    %c0_6 = arith.constant 0 : index
    %6 = vector.load %arg4[%c0_5, %c0_6] : memref<16x128xf32, #tpu.memory_space<vmem>>, vector<16x128xf32>
    tpu.vector_store %arg4[%c0_5, %c0_6], %5 {strides = array<i32>} : memref<16x128xf32, #tpu.memory_space<vmem>>, vector<16x128xf32>,
    return
  }
  func.func @transform_0(%arg0: i32) -> (i32, i32) {
    %c0_i32 = arith.constant 0 : i32
    %c0_i32_0 = arith.constant 0 : i32
    return %arg0, %c0_i32 : i32, i32
  }
  func.func @transform_1(%arg0: i32) -> (i32, i32) {
    %c0_i32 = arith.constant 0 : i32
    %c0_i32_0 = arith.constant 0 : i32
    %c0_i32_1 = arith.constant 0 : i32
    return %c0_i32, %c0_i32_0 : i32, i32
  }
  func.func @transform_2(%arg0: i32) -> (i32, i32) {
    %c0_i32 = arith.constant 0 : i32
    %c0_i32_0 = arith.constant 0 : i32
    %c0_i32_1 = arith.constant 0 : i32
    return %c0_i32, %c0_i32_0 : i32, i32
  }
  func.func @transform_3(%arg0: i32) -> (i32, i32) {
    %c0_i32 = arith.constant 0 : i32
    %c0_i32_0 = arith.constant 0 : i32
    return %arg0, %c0_i32 : i32, i32
  }
}

</mosaic_0001>

<bundles_post_ra>
// kernel: tpu_custom_call.1
= control target key start
LH: loop header
LB: loop body
LE: loop exit
PB: predicated region body
PF: predicated region fallthrough
CT: control target
= control target key end

     0   :  { %8 = vsyncpa [#allocation3], 0  ;;  %s324_s0 = inlined_call_operand.hbm [shape: f32[16,16], index: 0, kind: input, shape index: {}]   ;;  %s325_s1 = inlined_call_operand.hbm [shape: f32[16,128], index: 1, kind: input, shape index: {}]   ;;  %s326_s2 = inlined_call_operand.vmem [shape: f32[1,128], index: 2, kind: input, shape index: {}]   ;;  %s327_s3 = inlined_call_operand.hbm [shape: f32[16,128], index: 3, kind: output, shape index: {}]  }
   0x1   :  { %9 = vsyncpa [#allocation6], 0 }
   0x2   :  { %10 = vsyncpa [#allocation4], 0  ;;  %s251_s12 = smov [#allocation2]   ;;  %s179_s16 = scalar_lea.hbm %s324_s0, 256 }
   0x3   :  { %s16_s13 = sshll.u32 %s251_s12, 4  ;;  %p180_p0 = scmp.ne.s32.totalorder %s324_s0, %s179_s16  ;;  %s17_s13 = int_to_ptr.vmem [resolvable:$true] %s16_s13 }
   0x4   :  { %p183_p1 = scmp.lt.u32.totalorder %s179_s16, %s324_s0 }
   0x6   :  { %p185_p2 = pnand %p183_p1, %p180_p0 }
   0x8   :  { %188 = shalt.err (!%p185_p2)
}
   0x9   :  { %s189_s21 = scalar_lea.vmem %s17_s13, 256  ;;  %p194_p4 = scmp.lt.s32.totalorder %s17_s13, %s17_s13 }
   0xa   :  { %p190_p3 = scmp.ne.s32.totalorder %s17_s13, %s189_s21  ;;  %p195_p5 = scmp.lt.s32.totalorder %s189_s21, %s189_s21 }
   0xc   :  { %p196_p6 = por %p195_p5, %p194_p4 }
   0xe   :  { %p197_p7 = pnand %p196_p6, %p190_p3 }
  0x10   :  { %200 = shalt.err (!%p197_p7)
}
  0x11   :  { %s252_s22 = smov 128   ;;  %s253_s23 = smov 8  }
  0x12   :  { %22 = dma.hbm_to_vmem [thread:$0]  %s324_s0, 256, %s17_s13, [#allocation3], %s252_s22, %s252_s22, %s253_s23  }
  0x13   :  { %s254_s26 = smov [#allocation5]   ;;  %s201_s30 = scalar_lea.hbm %s325_s1, 256 }
  0x14   :  { %s28_s27 = sshll.u32 %s254_s26, 4  ;;  %p202_p8 = scmp.ne.s32.totalorder %s325_s1, %s201_s30  ;;  %s29_s27 = int_to_ptr.vmem [resolvable:$true] %s28_s27 }
  0x15   :  { %p205_p9 = scmp.lt.u32.totalorder %s201_s30, %s325_s1 }
  0x17   :  { %p207_p10 = pnand %p205_p9, %p202_p8 }
  0x19   :  { %210 = shalt.err (!%p207_p10)
}
  0x1a   :  { %s211_s8 = scalar_lea.vmem %s29_s27, 256  ;;  %p216_p12 = scmp.lt.s32.totalorder %s29_s27, %s29_s27 }
  0x1b   :  { %p212_p11 = scmp.ne.s32.totalorder %s29_s27, %s211_s8  ;;  %p217_p13 = scmp.lt.s32.totalorder %s211_s8, %s211_s8 }
  0x1d   :  { %p218_p0 = por %p217_p13, %p216_p12 }
  0x1f   :  { %p219_p1 = pnand %p218_p0, %p212_p11 }
  0x21   :  { %222 = shalt.err (!%p219_p1)
}
  0x22   :  { %34 = dma.hbm_to_vmem [thread:$0]  %s325_s1, 256, %s29_s27, [#allocation6], %s252_s22, %s252_s22, %s253_s23  }
  0x23   :  { %245 = dma.done.wait [#allocation3], 256  }
  0x24   :  { %246 = vsyncadd [#allocation3], 4294967040 }
  0x25   :  { %247 = dma.done.wait [#allocation6], 256  }
  0x26   :  { %248 = vsyncadd [#allocation6], 4294967040  ;;  %vm54_vm0 = vcmask 130048   ;;  %v45_v0 = vld [vmem:[#allocation5] sm:$0xff]  ;;  %v46_v1 = vld [vmem:[#allocation5 + $0x8] sm:$0xff]  ;;  %s255_s12 = smov [#allocation7]  }
  0x27   :  { %v43_v2 = vld [vmem:[#allocation2] sm:$0xff]  ;;  %v170_v3 = vpack.c.bf16 %v46_v1, %v45_v0  ;;  %v44_v4 = vld [vmem:[#allocation2 + $0x8] sm:$0xff]  ;;  %s143_s1 = sshll.u32 %s255_s12, 4  ;;  %s144_s1 = int_to_ptr.vmem [resolvable:$true] %s143_s1 }
  0x28   :  { %167 = vmatprep.mubr.msk.f32.mxu0 %vm54_vm0, %v43_v2  ;;  %v156_v5 = vld [vmem:[%s326_s2] ss:$0 sm:$0xff]  ;;  %s223_s13 = scalar_lea.vmem %s144_s1, 256  ;;  %p228_p3 = scmp.lt.s32.totalorder %s144_s1, %s144_s1 }
  0x29   :  { %171 = vmatprep.subr.bf16.mxu0 %v170_v3  ;;  %p224_p2 = scmp.ne.s32.totalorder %s144_s1, %s223_s13  ;;  %p229_p4 = scmp.lt.s32.totalorder %s223_s13, %s223_s13 }
  0x2a   :  { %173 = vmatpush3.bf16.msra.mxu0 %v170_v3 }
  0x2b   :  { %p230_p5 = por %p229_p4, %p228_p3 }
  0x2d   :  { %168 = vmatmul.mubr.msk.f32.vlgmr.msra.gmra.mrb[0].mxu0 %vm54_vm0, %v44_v4  ;;  %p231_p6 = pnand %p230_p5, %p224_p2 }
 0x100   :  { %v169_v6 = vpop.f32.mrb[0].mxu0 }
 0x101   :  { %v133_v7 = vadd.f32 %v169_v6, %v156_v5  ;;  %v127_v8 = vpop.f32.mrb[1].mxu0 }
 0x102   :  { %v128_v9 = vadd.f32 %v156_v5, %v127_v8 }
 0x103   :  { %137 = vst [vmem:[#allocation7 + $0x8] sm:$0xff] %v133_v7 }
 0x104   :  { %136 = vst [vmem:[#allocation7] sm:$0xff] %v128_v9 }
 0x105   :  { %234 = shalt.err (!%p231_p6)
}
 0x106   :  { %s235_s2 = scalar_lea.hbm %s327_s3, 256 }
 0x107   :  { %p236_p7 = scmp.ne.s32.totalorder %s327_s3, %s235_s2  ;;  %p239_p8 = scmp.lt.u32.totalorder %s235_s2, %s327_s3 }
 0x109   :  { %p241_p9 = pnand %p239_p8, %p236_p7 }
 0x10b   :  { %244 = shalt.err (!%p241_p9)
}
 0x10c   :  { %149 = dma.vmem_to_hbm [thread:$0]  %s144_s1, 256, %s327_s3, [#allocation4], %s252_s22, %s252_s22, %s253_s23  }
 0x10d   :  { %249 = dma.done.wait [#allocation4], 256  }
 0x10e   :  { %250 = vsyncadd [#allocation4], 4294967040 }
 0x10f   :  { %153 = vsyncpa [#allocation3], 1 }
 0x110   :  { %154 = vsyncpa [#allocation6], 1 }
 0x111   :  { %155 = vsyncpa [#allocation4], 1 }

</bundles_post_ra>
